<compile_context>
chip_gen: v7x
topology: tpu7x:2x2x1
jax: 0.10.0
libtpu: 0.0.40
codegen_flags: <defaults>
</compile_context>

<pallas_src>
import jax
import jax.numpy as jnp
from jax.experimental import pallas as pl
from jax.experimental.pallas import tpu as pltpu

LANE = 128
MAX_BATCH_TILE = 16384       # rows per grid step (sweep 8192-32768 at scale)
SMALL_BATCH_BYPASS = 4096    # below this, plain XLA beats any kernel launch


def _round_up(a, m):
    return ((a + m - 1) // m) * m


# ----------------------------------------------------------------------------
# Kernel: one affine map per batch tile.
#   x_ref: [TB, K]   w_ref: [K, 128] (lane-padded, only first out_dim cols real)
#   b_ref: [1, out_dim]   o_ref: [TB, out_dim]  (un-padded -> minimal writeback)
# ----------------------------------------------------------------------------
def fused_affine_kernel(x_ref, w_ref, b_ref, o_ref):
    n = o_ref.shape[-1]
    acc = jnp.dot(x_ref[...], w_ref[...], preferred_element_type=jnp.float32)
    o_ref[...] = (acc[:, :n] + b_ref[...]).astype(o_ref.dtype)


# ----------------------------------------------------------------------------
# Parameters (PyTorch nn.Linear init, weights stored transposed: [in, out]).
# ----------------------------------------------------------------------------
def init_params(key, input_dim, output_dim):
    dims = [input_dim, 64, 32, 16, 8, output_dim]
    params = []
    for i in range(5):
        fan_in, fan_out = dims[i], dims[i + 1]
        key, kw, kb = jax.random.split(key, 3)
        bound = 1.0 / jnp.sqrt(fan_in)
        w = jax.random.uniform(kw, (fan_in, fan_out), jnp.float32, -bound, bound)
        b = jax.random.uniform(kb, (1, fan_out), jnp.float32, -bound, bound)
        params.append((w, b))
    return params


def fuse_params(params, lane=LANE):
    """Collapse the linear chain into one affine map (done ONCE, off hot path).
    Only the weight matrix is lane-padded (for the in-kernel matmul); bias and
    the kernel output stay at the true out_dim."""
    w_eff, b_eff = params[0]
    for wi, bi in params[1:]:
        w_eff = w_eff @ wi
        b_eff = b_eff @ wi + bi
    out_dim = w_eff.shape[1]
    n_pad = _round_up(out_dim, lane)
    w_pad = jnp.pad(w_eff, ((0, 0), (0, n_pad - out_dim)))
    return w_pad, b_eff, out_dim


# ----------------------------------------------------------------------------
# Pallas path: batch-tiled grid, weights VMEM-resident, no wrapper pad/slice.
# ----------------------------------------------------------------------------
def mlp_forward_pallas(x, w_pad, b_eff, out_dim, *, compute_dtype=None):
    B, K = x.shape
    n_pad = w_pad.shape[1]
    out_dtype = jnp.float32

    if compute_dtype is not None:            # optional bandwidth saver (v5e/v6e)
        x = x.astype(compute_dtype)
        w_pad = w_pad.astype(compute_dtype)  # bias add stays f32 (post-accum)

    tb = min(MAX_BATCH_TILE, _round_up(B, 8))
    grid = (pl.cdiv(B, tb),)                 # partial last block handled by Pallas

    esize = jnp.dtype(x.dtype).itemsize
    cost = pl.CostEstimate(
        flops=2 * B * K * n_pad,
        transcendentals=0,
        bytes_accessed=(B * K + K * n_pad) * esize + (B * out_dim + out_dim) * 4,
    )

    return pl.pallas_call(
        fused_affine_kernel,
        out_shape=jax.ShapeDtypeStruct((B, out_dim), out_dtype),
        grid_spec=pltpu.PrefetchScalarGridSpec(
            num_scalar_prefetch=0,
            grid=grid,
            in_specs=[
                pl.BlockSpec((tb, K), lambda i: (i, 0)),       # x: streamed
                pl.BlockSpec((K, n_pad), lambda i: (0, 0)),    # W_eff: resident
                pl.BlockSpec((1, out_dim), lambda i: (0, 0)),  # b_eff: resident
            ],
            out_specs=pl.BlockSpec((tb, out_dim), lambda i: (i, 0)),
        ),
        compiler_params=pltpu.CompilerParams(
            dimension_semantics=("parallel",),      # independent batch tiles
            vmem_limit_bytes=40 * 1024 * 1024,      # headroom; < v7x 64 MiB phys
        ),
        cost_estimate=cost,
    )(x, w_pad, b_eff)


def mlp_forward(x, w_pad, b_eff, out_dim, *, force_pallas=False, compute_dtype=None):
    if x.shape[0] < SMALL_BATCH_BYPASS and not force_pallas:
        # Launch overhead dominates at small B: plain fused XLA dot is faster.
        return x @ w_pad[:, :out_dim] + b_eff
    return mlp_forward_pallas(x, w_pad, b_eff, out_dim, compute_dtype=compute_dtype)


# ----------------------------------------------------------------------------
# Pure-JAX reference: the original layer-by-layer forward (validates fusion).
# ----------------------------------------------------------------------------
def reference_forward(x, params):
    h = x
    for (w, b) in params:
        h = h @ w + b
    return h


if __name__ == "__main__":
    key = jax.random.PRNGKey(0)
    input_dim, output_dim = 32, 4
    kx1, kx2, kp = jax.random.split(key, 3)

    params = init_params(kp, input_dim, output_dim)
    w_pad, b_eff, out_dim = fuse_params(params)     # one-time preprocessing
    w_pad, b_eff = jax.block_until_ready((w_pad, b_eff))

    # 1) Small batch, tile-aligned, forced through the Pallas kernel.
    x1 = jax.random.normal(kx1, (64, input_dim), jnp.float32)
    out1 = jax.block_until_ready(
        mlp_forward(x1, w_pad, b_eff, out_dim, force_pallas=True))
    ref1 = reference_forward(x1, params)
    assert out1.shape == (64, output_dim)
    assert jnp.allclose(out1, ref1, atol=1e-4, rtol=1e-4), "pallas mismatch (aligned)"

    # 2) Batch not a multiple of the tile: exercises Pallas partial-block handling
    #    (no wrapper pad / slice anywhere).
    x2 = jax.random.normal(kx2, (52, input_dim), jnp.float32)
    out2 = jax.block_until_ready(
        mlp_forward(x2, w_pad, b_eff, out_dim, force_pallas=True))
    ref2 = reference_forward(x2, params)
    assert out2.shape == (52, output_dim)
    assert jnp.allclose(out2, ref2, atol=1e-4, rtol=1e-4), "pallas mismatch (partial)"

    # 3) Small-batch XLA bypass sanity check.
    out3 = jax.block_until_ready(mlp_forward(x1, w_pad, b_eff, out_dim))
    assert jnp.allclose(out3, ref1, atol=1e-4, rtol=1e-4), "bypass mismatch"

    print("KERNEL_OK")
</pallas_src>

<mosaic_0001>
module attributes {stable_mosaic.version = 11 : i64} {
  func.func @fused_affine_kernel(%arg0: i32, %arg1: memref<64x32xf32, #tpu.memory_space<vmem>>, %arg2: memref<32x128xf32, #tpu.memory_space<vmem>>, %arg3: memref<1x4xf32, #tpu.memory_space<vmem>>, %arg4: memref<64x4xf32, #tpu.memory_space<vmem>>) attributes {dimension_semantics = [#tpu.dimension_semantics<parallel>], iteration_bounds = array<i64: 1>, scalar_prefetch = 0 : i64, scratch_operands = 0 : i64, tpu.core_type = #tpu.core_type<tc>, window_params = [{transform_indices = @transform_0, window_bounds = array<i64: 64, 32>}, {pipeline_mode = #tpu.pipeline_mode<synchronous>, transform_indices = @transform_1, window_bounds = array<i64: 32, 128>}, {pipeline_mode = #tpu.pipeline_mode<synchronous>, transform_indices = @transform_2, window_bounds = array<i64: 1, 4>}, {transform_indices = @transform_3, window_bounds = array<i64: 64, 4>}]} {
    %c0 = arith.constant 0 : index
    %c0_0 = arith.constant 0 : index
    %0 = vector.load %arg1[%c0, %c0_0] : memref<64x32xf32, #tpu.memory_space<vmem>>, vector<64x32xf32>
    %c0_1 = arith.constant 0 : index
    %c0_2 = arith.constant 0 : index
    %1 = vector.load %arg2[%c0_1, %c0_2] : memref<32x128xf32, #tpu.memory_space<vmem>>, vector<32x128xf32>
    %cst = arith.constant dense<0.000000e+00> : vector<64x128xf32>
    %2 = tpu.matmul %0, %1, %cst {dimension_numbers = #tpu.dot_dimension_numbers<[1], [0], [0], [1], [0, 0, 1, 1], [], []>} : vector<64x32xf32>, vector<32x128xf32>, vector<64x128xf32> -> vector<64x128xf32>
    %3 = vector.extract_strided_slice %2 {offsets = [0, 0], sizes = [64, 4], strides = [1, 1]} : vector<64x128xf32> to vector<64x4xf32>
    %c0_3 = arith.constant 0 : index
    %c0_4 = arith.constant 0 : index
    %4 = vector.load %arg3[%c0_3, %c0_4] : memref<1x4xf32, #tpu.memory_space<vmem>>, vector<1x4xf32>
    %5 = vector.broadcast %4 : vector<1x4xf32> to vector<64x4xf32>
    %6 = arith.addf %3, %5 : vector<64x4xf32>
    %c0_5 = arith.constant 0 : index
    %c0_6 = arith.constant 0 : index
    %7 = vector.load %arg4[%c0_5, %c0_6] : memref<64x4xf32, #tpu.memory_space<vmem>>, vector<64x4xf32>
    tpu.vector_store %arg4[%c0_5, %c0_6], %6 {strides = array<i32>} : memref<64x4xf32, #tpu.memory_space<vmem>>, vector<64x4xf32>,
    return
  }
  func.func @transform_0(%arg0: i32) -> (i32, i32) {
    %c0_i32 = arith.constant 0 : i32
    %c0_i32_0 = arith.constant 0 : i32
    return %arg0, %c0_i32 : i32, i32
  }
  func.func @transform_1(%arg0: i32) -> (i32, i32) {
    %c0_i32 = arith.constant 0 : i32
    %c0_i32_0 = arith.constant 0 : i32
    %c0_i32_1 = arith.constant 0 : i32
    return %c0_i32, %c0_i32_0 : i32, i32
  }
  func.func @transform_2(%arg0: i32) -> (i32, i32) {
    %c0_i32 = arith.constant 0 : i32
    %c0_i32_0 = arith.constant 0 : i32
    %c0_i32_1 = arith.constant 0 : i32
    return %c0_i32, %c0_i32_0 : i32, i32
  }
  func.func @transform_3(%arg0: i32) -> (i32, i32) {
    %c0_i32 = arith.constant 0 : i32
    %c0_i32_0 = arith.constant 0 : i32
    return %arg0, %c0_i32 : i32, i32
  }
}

</mosaic_0001>

<bundles_post_ra>
// kernel: tpu_custom_call.1
= control target key start
LH: loop header
LB: loop body
LE: loop exit
PB: predicated region body
PF: predicated region fallthrough
CT: control target
= control target key end

     0   :  { %vm26_vm0 = vcmask 261120   ;;  %vm171_vm1 = vcmask 31744   ;;  %s336_s1 = inlined_call_operand.vmem [shape: f32[32,128], index: 1, kind: input, shape index: {}]   ;;  %s337_s0 = inlined_call_operand.vmem [shape: f32[64,32], index: 0, kind: input, shape index: {}]   ;;  %s338_s2 = inlined_call_operand.vmem [shape: f32[1,4], index: 2, kind: input, shape index: {}]   ;;  %s339_s3 = inlined_call_operand.vmem [shape: f32[64,4], index: 3, kind: output, shape index: {}]  }
   0x1   :  { %v22_v0 = vld [vmem:[%s336_s1] sm:$0xff]  ;;  %v23_v1 = vld [vmem:[%s336_s1 + $0x8] sm:$0xff]  ;;  %v24_v2 = vld [vmem:[%s336_s1 + $0x10] sm:$0xff] }
   0x2   :  { %v225_v3 = vpack.c.bf16 %v23_v1, %v22_v0  ;;  %v25_v4 = vld [vmem:[%s336_s1 + $0x18] sm:$0xff]  ;;  %v14_v5 = vld [vmem:[%s337_s0] sm:$0xff]  ;;  %v15_v8 = vld [vmem:[%s337_s0 + $0x8] sm:$0xff] }
   0x3   :  { %v18_v6 = vld [vmem:[%s337_s0 + $0x20] sm:$0xff]  ;;  %v229_v7 = vpack.c.bf16 %v25_v4, %v24_v2  ;;  %213 = vmatprep.mubr.msk.f32.mxu0 %vm26_vm0, %v14_v5  ;;  %v19_v9 = vld [vmem:[%s337_s0 + $0x28] sm:$0xff]  ;;  %v16_v10 = vld [vmem:[%s337_s0 + $0x10] sm:$0xff] }
   0x4   :  { %219 = vmatprep.mubr.msk.f32.mxu1 %vm26_vm0, %v18_v6  ;;  %226 = vmatprep.subr.bf16.mxu0 %v225_v3  ;;  %v20_v11 = vld [vmem:[%s337_s0 + $0x30] sm:$0xff]  ;;  %v17_v12 = vld [vmem:[%s337_s0 + $0x18] sm:$0xff]  ;;  %v192_v14 = vld [vmem:[%s338_s2] ss:$0 sm:$0xff] }
   0x5   :  { %233 = vmatprep.subr.bf16.mxu1 %v225_v3  ;;  %228 = vmatpush3.bf16.msra.mxu0 %v225_v3  ;;  %v21_v13 = vld [vmem:[%s337_s0 + $0x38] sm:$0xff] }
   0x6   :  { %235 = vmatpush3.bf16.msra.mxu1 %v225_v3  ;;  %230 = vmatprep.subr.bf16.mxu0 %v229_v7 }
   0x7   :  { %234 = vmatprep.subr.bf16.mxu1 %v229_v7 }
   0x9   :  { %232 = vmatpush3.bf16.msra.mxu0 %v229_v7 }
   0xa   :  { %236 = vmatpush3.bf16.msra.mxu1 %v229_v7 }
   0xc   :  { %214 = vmatmul.mubr.msk.f32.vlgmr.msra.gmra.mrb[0].mxu0 %vm26_vm0, %v15_v8 }
   0xd   :  { %220 = vmatmul.mubr.msk.f32.vlgmr.msra.gmra.mrb[0].mxu1 %vm26_vm0, %v19_v9  ;;  %216 = vmatprep.mubr.msk.f32.mxu0 %vm26_vm0, %v16_v10 }
   0xe   :  { %222 = vmatprep.mubr.msk.f32.mxu1 %vm26_vm0, %v20_v11 }
  0x10   :  { %217 = vmatmul.mubr.msk.f32.gmra.mrb[2].mxu0 %vm26_vm0, %v17_v12 }
  0x11   :  { %223 = vmatmul.mubr.msk.f32.gmra.mrb[2].mxu1 %vm26_vm0, %v21_v13 }
  0xdf   :  { %v215_v15 = vpop.f32.mrb[0].mxu0 }
  0xe0   :  { %v221_v16 = vpop.f32.mrb[0].mxu1  ;;  %v164_v17 = vadd.f32 %v215_v15, %v192_v14  ;;  %v117_v19 = vpop.f32.mrb[1].mxu0 }
  0xe1   :  { %v168_v18 = vadd.f32 %v221_v16, %v192_v14  ;;  %v137_v20 = vpop.f32.mrb[1].mxu1  ;;  %v163_v21 = vadd.f32 %v192_v14, %v117_v19 }
  0xe2   :  { %v167_v22 = vadd.f32 %v192_v14, %v137_v20  ;;  %173 = vst.msk [vmem:[%s339_s3 + $0x8] sm:$0xff] %vm171_vm1, %v164_v17 }
  0xe3   :  { %177 = vst.msk [vmem:[%s339_s3 + $0x28] sm:$0xff] %vm171_vm1, %v168_v18  ;;  %172 = vst.msk [vmem:[%s339_s3] sm:$0xff] %vm171_vm1, %v163_v21  ;;  %v218_v23 = vpop.f32.mrb[2].mxu0 }
  0xe4   :  { %176 = vst.msk [vmem:[%s339_s3 + $0x20] sm:$0xff] %vm171_vm1, %v167_v22  ;;  %v224_v24 = vpop.f32.mrb[2].mxu1  ;;  %v166_v25 = vadd.f32 %v218_v23, %v192_v14  ;;  %v127_v27 = vpop.f32.mrb[3].mxu0 }
  0xe5   :  { %v170_v26 = vadd.f32 %v224_v24, %v192_v14  ;;  %v147_v28 = vpop.f32.mrb[3].mxu1  ;;  %v165_v29 = vadd.f32 %v192_v14, %v127_v27 }
  0xe6   :  { %v169_v30 = vadd.f32 %v192_v14, %v147_v28  ;;  %175 = vst.msk [vmem:[%s339_s3 + $0x18] sm:$0xff] %vm171_vm1, %v166_v25 }
  0xe7   :  { %179 = vst.msk [vmem:[%s339_s3 + $0x38] sm:$0xff] %vm171_vm1, %v170_v26  ;;  %174 = vst.msk [vmem:[%s339_s3 + $0x10] sm:$0xff] %vm171_vm1, %v165_v29 }
  0xe8   :  { %178 = vst.msk [vmem:[%s339_s3 + $0x30] sm:$0xff] %vm171_vm1, %v169_v30 }

</bundles_post_ra>
